<compile_context>
chip_gen: v6e
topology: v6e:2x2x1
jax: 0.10.0
libtpu: 0.0.40
codegen_flags: <defaults>
</compile_context>

<pallas_src>
import jax
import jax.numpy as jnp
from jax.experimental import pallas as pl
from jax.experimental.pallas import tpu as pltpu


def vae_kernel(x_ref, n_ref, t_ref, eps_ref, wmu_ref, bmu_ref, wlv_ref,
               blv_ref, wdec_ref, bdec_ref, xr_ref, z_ref, stats_ref):
    """One batch tile of the VAE forward pass.

    x_ref:   [TB, F*T] padded input, feature-major / time-minor (module's [B,F,T]).
    n_ref:   [TB, 1]   int32 sequence lengths (0 for batch-padding rows).
    t_ref:   [1, F*T]  int32 time index of each lane (k % T, built on host).
    eps_ref: [TB, L]   standard-normal reparameterization noise.
    wmu/wlv: [F*T, L]  encoder weights with masked-mean pooling folded in.
    wdec:    [L, F*T]  decoder weights, feature-major columns.
    """
    x = x_ref[...]                                         # [TB, F*T]
    n_i = n_ref[...]                                       # [TB, 1] int32

    # padding mask: [1,FT] < [TB,1] -> [TB,FT]; no per-step iota / modulo.
    mask = (t_ref[...] < n_i).astype(jnp.float32)

    n = jnp.maximum(n_i.astype(jnp.float32), 1.0)          # guard N == 0 rows
    inv_n = pl.reciprocal(n, approx=True)                  # EUP slot, ~free

    xm = x * mask            # masked input (== x when input is pre-zero-padded)
    xs = xm * inv_n          # masked-mean pooling scale folded into the operand

    # ---- encode (synthetic rsrn.Classify): pooling folded into [FT, L] weights
    mu = jnp.dot(xs, wmu_ref[...],
                 preferred_element_type=jnp.float32) + bmu_ref[...]      # [TB, L]
    logvar = jnp.dot(xs, wlv_ref[...],
                     preferred_element_type=jnp.float32) + blv_ref[...]  # [TB, L]

    # ---- per-row KL divergence
    kld_row = -0.5 * jnp.sum(1.0 + logvar - mu * mu - jnp.exp(logvar),
                             axis=1, keepdims=True)                      # [TB, 1]

    # ---- reparameterization: z = mu + eps * exp(logvar / 2)
    z = mu + eps_ref[...] * jnp.exp(0.5 * logvar)                        # [TB, L]
    z_ref[...] = z

    # ---- decode (synthetic rsrn.Generate): linear L -> F*T, masked by N
    dec = jnp.dot(z, wdec_ref[...],
                  preferred_element_type=jnp.float32) + bdec_ref[...]    # [TB, F*T]
    xr = dec * mask
    xr_ref[...] = xr

    # ---- per-row reconstruction SSE / N (xm already masked; no extra multiply)
    # NOTE: if vreg spills show up at very large TB, re-read x_ref[...] here
    # instead of keeping xm live across the matmul chain.
    resid = xr - xm
    rec_row = jnp.sum(resid * resid, axis=1, keepdims=True) * inv_n      # [TB, 1]

    # zero stats for batch-padding rows (N == 0) so even a full-array sum is valid
    valid_row = (n_i > 0).astype(jnp.float32)
    stats_ref[...] = jnp.concatenate([kld_row, rec_row], axis=1) * valid_row


def _select_batch_tile(B, FT, L):
    """Largest multiple-of-8 batch tile that (a) fits a conservative VMEM budget
    valid on v5e / v6e / v7x and (b) leaves >= 2 grid steps so the "parallel"
    batch axis shards evenly across both v7x TensorCores."""
    budget = 24 << 20                                     # under a 32 MiB scoped limit
    weight_bytes = (3 * FT * L + 2 * L + 2 * FT) * 4      # single-buffered consts
    per_row_bytes = 4 * FT * 4 + 4 * (2 * L + 2) * 4      # x/xr + eps/z/stats (x2 buffers)
    tb = (budget - weight_bytes) // max(per_row_bytes, 1)
    tb = int(min(256, max(8, tb)))
    tb -= tb % 8
    half = -(-B // 2)                                     # ceil(B / 2)
    half = -(-half // 8) * 8                              # round up to sublane multiple
    return max(8, min(tb, max(8, half)))


def vae_forward(x_bft, lengths, eps, w_mu, b_mu, w_lv, b_lv, w_dec, b_dec,
                kl_coeff=0.1, batch_tile=None):
    """x_bft: [B, F, T] padded batch (the module's `x`); lengths: [B] int32;
    eps: [B, L] standard-normal noise.  w_dec columns are feature-major
    (column f*T + t), so no output transpose is needed."""
    B, F, T = x_bft.shape
    L = eps.shape[1]
    FT = F * T

    TB = _select_batch_tile(B, FT, L) if batch_tile is None else batch_tile
    n_tiles = pl.cdiv(B, TB)
    B_pad = n_tiles * TB

    x_flat = x_bft.reshape(B, FT)                         # free reshape, lane-dense
    n_col = lengths.astype(jnp.int32).reshape(B, 1)
    eps_p = eps
    if B_pad != B:
        pad = B_pad - B
        x_flat = jnp.pad(x_flat, ((0, pad), (0, 0)))
        n_col = jnp.pad(n_col, ((0, pad), (0, 0)))        # padded rows: N = 0
        eps_p = jnp.pad(eps, ((0, pad), (0, 0)))

    # host-side constants (built once): lane -> time index, and encoder weights
    # with the masked-mean pooling folded in (row f*T + t holds w[f, :]).
    t_row = jnp.tile(jnp.arange(T, dtype=jnp.int32), F).reshape(1, FT)
    w_mu_exp = jnp.repeat(w_mu, T, axis=0)                # [FT, L]
    w_lv_exp = jnp.repeat(w_lv, T, axis=0)                # [FT, L]

    def batch_spec(shape):
        return pl.BlockSpec(shape, lambda b: (b, 0))

    def run(single_buffer_weights):
        if single_buffer_weights:
            def const_spec(shape):                        # fetched once; 1 VMEM copy
                return pl.BlockSpec(shape, lambda b: (0, 0),
                                    pipeline_mode=pl.Buffered(1))
        else:
            def const_spec(shape):
                return pl.BlockSpec(shape, lambda b: (0, 0))

        return pl.pallas_call(
            vae_kernel,
            out_shape=(
                jax.ShapeDtypeStruct((B_pad, FT), jnp.float32),  # xr (flat, lane-dense)
                jax.ShapeDtypeStruct((B_pad, L), jnp.float32),   # z
                jax.ShapeDtypeStruct((B_pad, 2), jnp.float32),   # per-row (kld, recon)
            ),
            grid_spec=pltpu.PrefetchScalarGridSpec(
                num_scalar_prefetch=0,
                grid=(n_tiles,),
                in_specs=[
                    batch_spec((TB, FT)),      # x
                    batch_spec((TB, 1)),       # lengths
                    const_spec((1, FT)),       # lane -> time index
                    batch_spec((TB, L)),       # eps
                    const_spec((FT, L)),       # w_mu (pool-folded)
                    const_spec((1, L)),        # b_mu
                    const_spec((FT, L)),       # w_logvar (pool-folded)
                    const_spec((1, L)),        # b_logvar
                    const_spec((L, FT)),       # w_dec (feature-major columns)
                    const_spec((1, FT)),       # b_dec
                ],
                out_specs=(
                    batch_spec((TB, FT)),      # xr
                    batch_spec((TB, L)),       # z
                    batch_spec((TB, 2)),       # stats
                ),
            ),
            compiler_params=pltpu.CompilerParams(
                dimension_semantics=("parallel",),
                vmem_limit_bytes=32 * 1024 * 1024),
        )(x_flat, n_col, t_row, eps_p, w_mu_exp, b_mu, w_lv_exp, b_lv,
          w_dec, b_dec)

    try:
        xr_flat, z_p, stats = run(single_buffer_weights=True)
    except Exception:
        # pipeline_mode=pl.Buffered(1) unavailable -> default double buffering
        xr_flat, z_p, stats = run(single_buffer_weights=False)

    xr = xr_flat[:B].reshape(B, F, T)
    z = z_p[:B]
    kld = jnp.sum(stats[:B, 0])
    recon = jnp.sum(stats[:B, 1])
    loss = recon + kl_coeff * kld
    return x_bft, xr, z, loss, kld, recon


if __name__ == "__main__":
    B, T, F, L = 16, 8, 16, 8          # batch, max seq len, features, latent
    KL = 0.1

    key = jax.random.PRNGKey(0)
    k_x, k_len, k_eps, k_wm, k_bm, k_wl, k_bl, k_wd, k_bd = jax.random.split(key, 9)

    # variable-length sequences (the torch module's `xs`), zero-padded
    lengths = jax.random.randint(k_len, (B,), 3, T + 1, dtype=jnp.int32)
    x_full = jax.random.normal(k_x, (B, T, F), dtype=jnp.float32)
    valid = (jnp.arange(T)[None, :] < lengths[:, None]).astype(jnp.float32)
    x_pad = x_full * valid[:, :, None]                 # pad_sequence(xs, batch_first=True)
    x_bft = jnp.transpose(x_pad, (0, 2, 1))            # module's x: [B, F, T]

    eps = jax.random.normal(k_eps, (B, L), dtype=jnp.float32)   # torch.randn_like(mu)

    # deterministic synthetic encode/decode parameters (see TODO at top)
    w_mu = 0.1 * jax.random.normal(k_wm, (F, L), dtype=jnp.float32)
    b_mu = 0.1 * jax.random.normal(k_bm, (1, L), dtype=jnp.float32)
    w_lv = 0.1 * jax.random.normal(k_wl, (F, L), dtype=jnp.float32)
    b_lv = 0.1 * jax.random.normal(k_bl, (1, L), dtype=jnp.float32)
    w_dec = 0.1 * jax.random.normal(k_wd, (L, F * T), dtype=jnp.float32)
    b_dec = 0.1 * jax.random.normal(k_bd, (1, F * T), dtype=jnp.float32)

    x, xr, z, loss, kld, recon = jax.block_until_ready(
        vae_forward(x_bft, lengths, eps, w_mu, b_mu, w_lv, b_lv, w_dec, b_dec,
                    kl_coeff=KL))

    # ---- pure-JAX reference of the same synthetic forward pass ----
    n_f = jnp.maximum(lengths.astype(jnp.float32), 1.0)[:, None]
    pooled_r = jnp.sum(x_pad * valid[:, :, None], axis=1) / n_f
    mu_r = pooled_r @ w_mu + b_mu
    lv_r = pooled_r @ w_lv + b_lv
    kld_r = jnp.sum(-0.5 * jnp.sum(1.0 + lv_r - mu_r ** 2 - jnp.exp(lv_r), axis=1))
    z_r = mu_r + eps * jnp.exp(0.5 * lv_r)
    xr_r = ((z_r @ w_dec + b_dec).reshape(B, F, T)) * valid[:, None, :]
    rec_r = jnp.sum(jnp.sum((xr_r - x_bft) ** 2, axis=(1, 2)) / n_f[:, 0])
    loss_r = rec_r + KL * kld_r

    assert x.shape == (B, F, T) and xr.shape == (B, F, T) and z.shape == (B, L)
    assert loss.shape == () and kld.shape == () and recon.shape == ()
    assert jnp.isfinite(loss) and jnp.isfinite(kld) and jnp.isfinite(recon)

    def close(a, b, tol=3e-2):
        return bool(jnp.max(jnp.abs(a - b)) <= tol * (1.0 + jnp.max(jnp.abs(b))))

    assert close(xr, xr_r) and close(z, z_r)
    assert close(loss, loss_r) and close(kld, kld_r) and close(recon, rec_r)

    print("KERNEL_OK")
</pallas_src>

<mosaic_0001>
module attributes {stable_mosaic.version = 11 : i64} {
  func.func @vae_kernel(%arg0: i32, %arg1: memref<8x128xf32, #tpu.memory_space<vmem>>, %arg2: memref<8x1xi32, #tpu.memory_space<vmem>>, %arg3: memref<1x128xi32, #tpu.memory_space<vmem>>, %arg4: memref<8x8xf32, #tpu.memory_space<vmem>>, %arg5: memref<128x8xf32, #tpu.memory_space<vmem>>, %arg6: memref<1x8xf32, #tpu.memory_space<vmem>>, %arg7: memref<128x8xf32, #tpu.memory_space<vmem>>, %arg8: memref<1x8xf32, #tpu.memory_space<vmem>>, %arg9: memref<8x128xf32, #tpu.memory_space<vmem>>, %arg10: memref<1x128xf32, #tpu.memory_space<vmem>>, %arg11: memref<8x128xf32, #tpu.memory_space<vmem>>, %arg12: memref<8x8xf32, #tpu.memory_space<vmem>>, %arg13: memref<8x2xf32, #tpu.memory_space<vmem>>) attributes {dimension_semantics = [#tpu.dimension_semantics<parallel>], iteration_bounds = array<i64: 2>, scalar_prefetch = 0 : i64, scratch_operands = 0 : i64, tpu.core_type = #tpu.core_type<tc>, window_params = [{transform_indices = @transform_0, window_bounds = array<i64: 8, 128>}, {transform_indices = @transform_1, window_bounds = array<i64: 8, 1>}, {pipeline_mode = #tpu.pipeline_mode<synchronous>, transform_indices = @transform_2, window_bounds = array<i64: 1, 128>}, {transform_indices = @transform_3, window_bounds = array<i64: 8, 8>}, {pipeline_mode = #tpu.pipeline_mode<synchronous>, transform_indices = @transform_4, window_bounds = array<i64: 128, 8>}, {pipeline_mode = #tpu.pipeline_mode<synchronous>, transform_indices = @transform_5, window_bounds = array<i64: 1, 8>}, {pipeline_mode = #tpu.pipeline_mode<synchronous>, transform_indices = @transform_6, window_bounds = array<i64: 128, 8>}, {pipeline_mode = #tpu.pipeline_mode<synchronous>, transform_indices = @transform_7, window_bounds = array<i64: 1, 8>}, {pipeline_mode = #tpu.pipeline_mode<synchronous>, transform_indices = @transform_8, window_bounds = array<i64: 8, 128>}, {pipeline_mode = #tpu.pipeline_mode<synchronous>, transform_indices = @transform_9, window_bounds = array<i64: 1, 128>}, {transform_indices = @transform_10, window_bounds = array<i64: 8, 128>}, {transform_indices = @transform_11, window_bounds = array<i64: 8, 8>}, {transform_indices = @transform_12, window_bounds = array<i64: 8, 2>}]} {
    %c0 = arith.constant 0 : index
    %c0_0 = arith.constant 0 : index
    %0 = vector.load %arg1[%c0, %c0_0] : memref<8x128xf32, #tpu.memory_space<vmem>>, vector<8x128xf32>
    %c0_1 = arith.constant 0 : index
    %c0_2 = arith.constant 0 : index
    %1 = vector.load %arg2[%c0_1, %c0_2] : memref<8x1xi32, #tpu.memory_space<vmem>>, vector<8x1xi32>
    %c0_3 = arith.constant 0 : index
    %c0_4 = arith.constant 0 : index
    %2 = vector.load %arg3[%c0_3, %c0_4] : memref<1x128xi32, #tpu.memory_space<vmem>>, vector<1x128xi32>
    %3 = vector.broadcast %2 : vector<1x128xi32> to vector<8x128xi32>
    %4 = vector.broadcast %1 : vector<8x1xi32> to vector<8x128xi32>
    %5 = arith.cmpi slt, %3, %4 : vector<8x128xi32>
    %6 = arith.extui %5 : vector<8x128xi1> to vector<8x128xi32>
    %7 = arith.sitofp %6 : vector<8x128xi32> to vector<8x128xf32>
    %8 = arith.sitofp %1 : vector<8x1xi32> to vector<8x1xf32>
    %cst = arith.constant 1.000000e+00 : f32
    %9 = vector.broadcast %cst : f32 to vector<8x1xf32>
    %10 = arith.maximumf %8, %9 : vector<8x1xf32>
    %11 = tpu.reciprocal %10 {approx = true} : vector<8x1xf32> -> vector<8x1xf32>
    %12 = arith.mulf %0, %7 : vector<8x128xf32>
    %13 = vector.broadcast %11 : vector<8x1xf32> to vector<8x128xf32>
    %14 = arith.mulf %12, %13 : vector<8x128xf32>
    %c0_5 = arith.constant 0 : index
    %c0_6 = arith.constant 0 : index
    %15 = vector.load %arg5[%c0_5, %c0_6] : memref<128x8xf32, #tpu.memory_space<vmem>>, vector<128x8xf32>
    %cst_7 = arith.constant dense<0.000000e+00> : vector<8x8xf32>
    %16 = tpu.matmul %14, %15, %cst_7 {dimension_numbers = #tpu.dot_dimension_numbers<[1], [0], [0], [1], [0, 0, 1, 1], [], []>} : vector<8x128xf32>, vector<128x8xf32>, vector<8x8xf32> -> vector<8x8xf32>
    %c0_8 = arith.constant 0 : index
    %c0_9 = arith.constant 0 : index
    %17 = vector.load %arg6[%c0_8, %c0_9] : memref<1x8xf32, #tpu.memory_space<vmem>>, vector<1x8xf32>
    %18 = vector.broadcast %17 : vector<1x8xf32> to vector<8x8xf32>
    %19 = arith.addf %16, %18 : vector<8x8xf32>
    %c0_10 = arith.constant 0 : index
    %c0_11 = arith.constant 0 : index
    %20 = vector.load %arg7[%c0_10, %c0_11] : memref<128x8xf32, #tpu.memory_space<vmem>>, vector<128x8xf32>
    %cst_12 = arith.constant dense<0.000000e+00> : vector<8x8xf32>
    %21 = tpu.matmul %14, %20, %cst_12 {dimension_numbers = #tpu.dot_dimension_numbers<[1], [0], [0], [1], [0, 0, 1, 1], [], []>} : vector<8x128xf32>, vector<128x8xf32>, vector<8x8xf32> -> vector<8x8xf32>
    %c0_13 = arith.constant 0 : index
    %c0_14 = arith.constant 0 : index
    %22 = vector.load %arg8[%c0_13, %c0_14] : memref<1x8xf32, #tpu.memory_space<vmem>>, vector<1x8xf32>
    %23 = vector.broadcast %22 : vector<1x8xf32> to vector<8x8xf32>
    %24 = arith.addf %21, %23 : vector<8x8xf32>
    %cst_15 = arith.constant 1.000000e+00 : f32
    %25 = vector.broadcast %cst_15 : f32 to vector<8x8xf32>
    %26 = arith.addf %25, %24 : vector<8x8xf32>
    %27 = arith.mulf %19, %19 : vector<8x8xf32>
    %28 = arith.subf %26, %27 : vector<8x8xf32>
    %29 = math.exp %24 : vector<8x8xf32>
    %30 = arith.subf %28, %29 : vector<8x8xf32>
    %cst_16 = arith.constant dense<0.000000e+00> : vector<8xf32>
    %31 = vector.multi_reduction <add>, %30, %cst_16 [1] : vector<8x8xf32> to vector<8xf32>
    %32 = vector.shape_cast %31 : vector<8xf32> to vector<8x1xf32>
    %cst_17 = arith.constant -5.000000e-01 : f32
    %33 = vector.broadcast %cst_17 : f32 to vector<8x1xf32>
    %34 = arith.mulf %33, %32 : vector<8x1xf32>
    %c0_18 = arith.constant 0 : index
    %c0_19 = arith.constant 0 : index
    %35 = vector.load %arg4[%c0_18, %c0_19] : memref<8x8xf32, #tpu.memory_space<vmem>>, vector<8x8xf32>
    %cst_20 = arith.constant 5.000000e-01 : f32
    %36 = vector.broadcast %cst_20 : f32 to vector<8x8xf32>
    %37 = arith.mulf %36, %24 : vector<8x8xf32>
    %38 = math.exp %37 : vector<8x8xf32>
    %39 = arith.mulf %35, %38 : vector<8x8xf32>
    %40 = arith.addf %19, %39 : vector<8x8xf32>
    %c0_21 = arith.constant 0 : index
    %c0_22 = arith.constant 0 : index
    %41 = vector.load %arg12[%c0_21, %c0_22] : memref<8x8xf32, #tpu.memory_space<vmem>>, vector<8x8xf32>
    tpu.vector_store %arg12[%c0_21, %c0_22], %40 {strides = array<i32>} : memref<8x8xf32, #tpu.memory_space<vmem>>, vector<8x8xf32>,
    %c0_23 = arith.constant 0 : index
    %c0_24 = arith.constant 0 : index
    %42 = vector.load %arg9[%c0_23, %c0_24] : memref<8x128xf32, #tpu.memory_space<vmem>>, vector<8x128xf32>
    %cst_25 = arith.constant dense<0.000000e+00> : vector<8x128xf32>
    %43 = tpu.matmul %40, %42, %cst_25 {dimension_numbers = #tpu.dot_dimension_numbers<[1], [0], [0], [1], [0, 0, 1, 1], [], []>} : vector<8x8xf32>, vector<8x128xf32>, vector<8x128xf32> -> vector<8x128xf32>
    %c0_26 = arith.constant 0 : index
    %c0_27 = arith.constant 0 : index
    %44 = vector.load %arg10[%c0_26, %c0_27] : memref<1x128xf32, #tpu.memory_space<vmem>>, vector<1x128xf32>
    %45 = vector.broadcast %44 : vector<1x128xf32> to vector<8x128xf32>
    %46 = arith.addf %43, %45 : vector<8x128xf32>
    %47 = arith.mulf %46, %7 : vector<8x128xf32>
    %c0_28 = arith.constant 0 : index
    %c0_29 = arith.constant 0 : index
    %48 = vector.load %arg11[%c0_28, %c0_29] : memref<8x128xf32, #tpu.memory_space<vmem>>, vector<8x128xf32>
    tpu.vector_store %arg11[%c0_28, %c0_29], %47 {strides = array<i32>} : memref<8x128xf32, #tpu.memory_space<vmem>>, vector<8x128xf32>,
    %49 = arith.subf %47, %12 : vector<8x128xf32>
    %50 = arith.mulf %49, %49 : vector<8x128xf32>
    %cst_30 = arith.constant dense<0.000000e+00> : vector<8xf32>
    %51 = vector.multi_reduction <add>, %50, %cst_30 [1] : vector<8x128xf32> to vector<8xf32>
    %52 = vector.shape_cast %51 : vector<8xf32> to vector<8x1xf32>
    %53 = arith.mulf %52, %11 : vector<8x1xf32>
    %c0_i32 = arith.constant 0 : i32
    %54 = vector.broadcast %c0_i32 : i32 to vector<8x1xi32>
    %55 = arith.cmpi sgt, %1, %54 : vector<8x1xi32>
    %56 = arith.extui %55 : vector<8x1xi1> to vector<8x1xi32>
    %57 = arith.sitofp %56 : vector<8x1xi32> to vector<8x1xf32>
    %58 = tpu.concatenate %34, %53 in 1 : vector<8x1xf32>, vector<8x1xf32> -> vector<8x2xf32>
    %59 = vector.broadcast %57 : vector<8x1xf32> to vector<8x2xf32>
    %60 = arith.mulf %58, %59 : vector<8x2xf32>
    %c0_31 = arith.constant 0 : index
    %c0_32 = arith.constant 0 : index
    %61 = vector.load %arg13[%c0_31, %c0_32] : memref<8x2xf32, #tpu.memory_space<vmem>>, vector<8x2xf32>
    tpu.vector_store %arg13[%c0_31, %c0_32], %60 {strides = array<i32>} : memref<8x2xf32, #tpu.memory_space<vmem>>, vector<8x2xf32>,
    return
  }
  func.func @transform_0(%arg0: i32) -> (i32, i32) {
    %c0_i32 = arith.constant 0 : i32
    %c0_i32_0 = arith.constant 0 : i32
    return %arg0, %c0_i32 : i32, i32
  }
  func.func @transform_1(%arg0: i32) -> (i32, i32) {
    %c0_i32 = arith.constant 0 : i32
    %c0_i32_0 = arith.constant 0 : i32
    return %arg0, %c0_i32 : i32, i32
  }
  func.func @transform_2(%arg0: i32) -> (i32, i32) {
    %c0_i32 = arith.constant 0 : i32
    %c0_i32_0 = arith.constant 0 : i32
    %c0_i32_1 = arith.constant 0 : i32
    return %c0_i32, %c0_i32_0 : i32, i32
  }
  func.func @transform_3(%arg0: i32) -> (i32, i32) {
    %c0_i32 = arith.constant 0 : i32
    %c0_i32_0 = arith.constant 0 : i32
    return %arg0, %c0_i32 : i32, i32
  }
  func.func @transform_4(%arg0: i32) -> (i32, i32) {
    %c0_i32 = arith.constant 0 : i32
    %c0_i32_0 = arith.constant 0 : i32
    %c0_i32_1 = arith.constant 0 : i32
    return %c0_i32, %c0_i32_0 : i32, i32
  }
  func.func @transform_5(%arg0: i32) -> (i32, i32) {
    %c0_i32 = arith.constant 0 : i32
    %c0_i32_0 = arith.constant 0 : i32
    %c0_i32_1 = arith.constant 0 : i32
    return %c0_i32, %c0_i32_0 : i32, i32
  }
  func.func @transform_6(%arg0: i32) -> (i32, i32) {
    %c0_i32 = arith.constant 0 : i32
    %c0_i32_0 = arith.constant 0 : i32
    %c0_i32_1 = arith.constant 0 : i32
    return %c0_i32, %c0_i32_0 : i32, i32
  }
  func.func @transform_7(%arg0: i32) -> (i32, i32) {
    %c0_i32 = arith.constant 0 : i32
    %c0_i32_0 = arith.constant 0 : i32
    %c0_i32_1 = arith.constant 0 : i32
    return %c0_i32, %c0_i32_0 : i32, i32
  }
  func.func @transform_8(%arg0: i32) -> (i32, i32) {
    %c0_i32 = arith.constant 0 : i32
    %c0_i32_0 = arith.constant 0 : i32
    %c0_i32_1 = arith.constant 0 : i32
    return %c0_i32, %c0_i32_0 : i32, i32
  }
  func.func @transform_9(%arg0: i32) -> (i32, i32) {
    %c0_i32 = arith.constant 0 : i32
    %c0_i32_0 = arith.constant 0 : i32
    %c0_i32_1 = arith.constant 0 : i32
    return %c0_i32, %c0_i32_0 : i32, i32
  }
  func.func @transform_10(%arg0: i32) -> (i32, i32) {
    %c0_i32 = arith.constant 0 : i32
    %c0_i32_0 = arith.constant 0 : i32
    return %arg0, %c0_i32 : i32, i32
  }
  func.func @transform_11(%arg0: i32) -> (i32, i32) {
    %c0_i32 = arith.constant 0 : i32
    %c0_i32_0 = arith.constant 0 : i32
    return %arg0, %c0_i32 : i32, i32
  }
  func.func @transform_12(%arg0: i32) -> (i32, i32) {
    %c0_i32 = arith.constant 0 : i32
    %c0_i32_0 = arith.constant 0 : i32
    return %arg0, %c0_i32 : i32, i32
  }
}

module attributes {stable_mosaic.version = 11 : i64} {
  func.func @vae_kernel(%arg0: i32, %arg1: memref<8x128xf32, #tpu.memory_space<vmem>>, %arg2: memref<8x1xi32, #tpu.memory_space<vmem>>, %arg3: memref<1x128xi32, #tpu.memory_space<vmem>>, %arg4: memref<8x8xf32, #tpu.memory_space<vmem>>, %arg5: memref<128x8xf32, #tpu.memory_space<vmem>>, %arg6: memref<1x8xf32, #tpu.memory_space<vmem>>, %arg7: memref<128x8xf32, #tpu.memory_space<vmem>>, %arg8: memref<1x8xf32, #tpu.memory_space<vmem>>, %arg9: memref<8x128xf32, #tpu.memory_space<vmem>>, %arg10: memref<1x128xf32, #tpu.memory_space<vmem>>, %arg11: memref<8x128xf32, #tpu.memory_space<vmem>>, %arg12: memref<8x8xf32, #tpu.memory_space<vmem>>, %arg13: memref<8x2xf32, #tpu.memory_space<vmem>>) attributes {dimension_semantics = [#tpu.dimension_semantics<parallel>], iteration_bounds = array<i64: 2>, scalar_prefetch = 0 : i64, scratch_operands = 0 : i64, tpu.core_type = #tpu.core_type<tc>, window_params = [{transform_indices = @transform_0, window_bounds = array<i64: 8, 128>}, {transform_indices = @transform_1, window_bounds = array<i64: 8, 1>}, {pipeline_mode = #tpu.pipeline_mode<synchronous>, transform_indices = @transform_2, window_bounds = array<i64: 1, 128>}, {transform_indices = @transform_3, window_bounds = array<i64: 8, 8>}, {pipeline_mode = #tpu.pipeline_mode<synchronous>, transform_indices = @transform_4, window_bounds = array<i64: 128, 8>}, {pipeline_mode = #tpu.pipeline_mode<synchronous>, transform_indices = @transform_5, window_bounds = array<i64: 1, 8>}, {pipeline_mode = #tpu.pipeline_mode<synchronous>, transform_indices = @transform_6, window_bounds = array<i64: 128, 8>}, {pipeline_mode = #tpu.pipeline_mode<synchronous>, transform_indices = @transform_7, window_bounds = array<i64: 1, 8>}, {pipeline_mode = #tpu.pipeline_mode<synchronous>, transform_indices = @transform_8, window_bounds = array<i64: 8, 128>}, {pipeline_mode = #tpu.pipeline_mode<synchronous>, transform_indices = @transform_9, window_bounds = array<i64: 1, 128>}, {transform_indices = @transform_10, window_bounds = array<i64: 8, 128>}, {transform_indices = @transform_11, window_bounds = array<i64: 8, 8>}, {transform_indices = @transform_12, window_bounds = array<i64: 8, 2>}]} {
    %c0 = arith.constant 0 : index
    %c0_0 = arith.constant 0 : index
    %0 = vector.load %arg1[%c0, %c0_0] : memref<8x128xf32, #tpu.memory_space<vmem>>, vector<8x128xf32>
    %c0_1 = arith.constant 0 : index
    %c0_2 = arith.constant 0 : index
    %1 = vector.load %arg2[%c0_1, %c0_2] : memref<8x1xi32, #tpu.memory_space<vmem>>, vector<8x1xi32>
    %c0_3 = arith.constant 0 : index
    %c0_4 = arith.constant 0 : index
    %2 = vector.load %arg3[%c0_3, %c0_4] : memref<1x128xi32, #tpu.memory_space<vmem>>, vector<1x128xi32>
    %3 = vector.broadcast %2 : vector<1x128xi32> to vector<8x128xi32>
    %4 = vector.broadcast %1 : vector<8x1xi32> to vector<8x128xi32>
    %5 = arith.cmpi slt, %3, %4 : vector<8x128xi32>
    %6 = arith.extui %5 : vector<8x128xi1> to vector<8x128xi32>
    %7 = arith.sitofp %6 : vector<8x128xi32> to vector<8x128xf32>
    %8 = arith.sitofp %1 : vector<8x1xi32> to vector<8x1xf32>
    %cst = arith.constant 1.000000e+00 : f32
    %9 = vector.broadcast %cst : f32 to vector<8x1xf32>
    %10 = arith.maximumf %8, %9 : vector<8x1xf32>
    %11 = tpu.reciprocal %10 {approx = true} : vector<8x1xf32> -> vector<8x1xf32>
    %12 = arith.mulf %0, %7 : vector<8x128xf32>
    %13 = vector.broadcast %11 : vector<8x1xf32> to vector<8x128xf32>
    %14 = arith.mulf %12, %13 : vector<8x128xf32>
    %c0_5 = arith.constant 0 : index
    %c0_6 = arith.constant 0 : index
    %15 = vector.load %arg5[%c0_5, %c0_6] : memref<128x8xf32, #tpu.memory_space<vmem>>, vector<128x8xf32>
    %cst_7 = arith.constant dense<0.000000e+00> : vector<8x8xf32>
    %16 = tpu.matmul %14, %15, %cst_7 {dimension_numbers = #tpu.dot_dimension_numbers<[1], [0], [0], [1], [0, 0, 1, 1], [], []>} : vector<8x128xf32>, vector<128x8xf32>, vector<8x8xf32> -> vector<8x8xf32>
    %c0_8 = arith.constant 0 : index
    %c0_9 = arith.constant 0 : index
    %17 = vector.load %arg6[%c0_8, %c0_9] : memref<1x8xf32, #tpu.memory_space<vmem>>, vector<1x8xf32>
    %18 = vector.broadcast %17 : vector<1x8xf32> to vector<8x8xf32>
    %19 = arith.addf %16, %18 : vector<8x8xf32>
    %c0_10 = arith.constant 0 : index
    %c0_11 = arith.constant 0 : index
    %20 = vector.load %arg7[%c0_10, %c0_11] : memref<128x8xf32, #tpu.memory_space<vmem>>, vector<128x8xf32>
    %cst_12 = arith.constant dense<0.000000e+00> : vector<8x8xf32>
    %21 = tpu.matmul %14, %20, %cst_12 {dimension_numbers = #tpu.dot_dimension_numbers<[1], [0], [0], [1], [0, 0, 1, 1], [], []>} : vector<8x128xf32>, vector<128x8xf32>, vector<8x8xf32> -> vector<8x8xf32>
    %c0_13 = arith.constant 0 : index
    %c0_14 = arith.constant 0 : index
    %22 = vector.load %arg8[%c0_13, %c0_14] : memref<1x8xf32, #tpu.memory_space<vmem>>, vector<1x8xf32>
    %23 = vector.broadcast %22 : vector<1x8xf32> to vector<8x8xf32>
    %24 = arith.addf %21, %23 : vector<8x8xf32>
    %cst_15 = arith.constant 1.000000e+00 : f32
    %25 = vector.broadcast %cst_15 : f32 to vector<8x8xf32>
    %26 = arith.addf %25, %24 : vector<8x8xf32>
    %27 = arith.mulf %19, %19 : vector<8x8xf32>
    %28 = arith.subf %26, %27 : vector<8x8xf32>
    %29 = math.exp %24 : vector<8x8xf32>
    %30 = arith.subf %28, %29 : vector<8x8xf32>
    %cst_16 = arith.constant dense<0.000000e+00> : vector<8xf32>
    %31 = vector.multi_reduction <add>, %30, %cst_16 [1] : vector<8x8xf32> to vector<8xf32>
    %32 = vector.shape_cast %31 : vector<8xf32> to vector<8x1xf32>
    %cst_17 = arith.constant -5.000000e-01 : f32
    %33 = vector.broadcast %cst_17 : f32 to vector<8x1xf32>
    %34 = arith.mulf %33, %32 : vector<8x1xf32>
    %c0_18 = arith.constant 0 : index
    %c0_19 = arith.constant 0 : index
    %35 = vector.load %arg4[%c0_18, %c0_19] : memref<8x8xf32, #tpu.memory_space<vmem>>, vector<8x8xf32>
    %cst_20 = arith.constant 5.000000e-01 : f32
    %36 = vector.broadcast %cst_20 : f32 to vector<8x8xf32>
    %37 = arith.mulf %36, %24 : vector<8x8xf32>
    %38 = math.exp %37 : vector<8x8xf32>
    %39 = arith.mulf %35, %38 : vector<8x8xf32>
    %40 = arith.addf %19, %39 : vector<8x8xf32>
    %c0_21 = arith.constant 0 : index
    %c0_22 = arith.constant 0 : index
    %41 = vector.load %arg12[%c0_21, %c0_22] : memref<8x8xf32, #tpu.memory_space<vmem>>, vector<8x8xf32>
    tpu.vector_store %arg12[%c0_21, %c0_22], %40 {strides = array<i32>} : memref<8x8xf32, #tpu.memory_space<vmem>>, vector<8x8xf32>,
    %c0_23 = arith.constant 0 : index
    %c0_24 = arith.constant 0 : index
    %42 = vector.load %arg9[%c0_23, %c0_24] : memref<8x128xf32, #tpu.memory_space<vmem>>, vector<8x128xf32>
    %cst_25 = arith.constant dense<0.000000e+00> : vector<8x128xf32>
    %43 = tpu.matmul %40, %42, %cst_25 {dimension_numbers = #tpu.dot_dimension_numbers<[1], [0], [0], [1], [0, 0, 1, 1], [], []>} : vector<8x8xf32>, vector<8x128xf32>, vector<8x128xf32> -> vector<8x128xf32>
    %c0_26 = arith.constant 0 : index
    %c0_27 = arith.constant 0 : index
    %44 = vector.load %arg10[%c0_26, %c0_27] : memref<1x128xf32, #tpu.memory_space<vmem>>, vector<1x128xf32>
    %45 = vector.broadcast %44 : vector<1x128xf32> to vector<8x128xf32>
    %46 = arith.addf %43, %45 : vector<8x128xf32>
    %47 = arith.mulf %46, %7 : vector<8x128xf32>
    %c0_28 = arith.constant 0 : index
    %c0_29 = arith.constant 0 : index
    %48 = vector.load %arg11[%c0_28, %c0_29] : memref<8x128xf32, #tpu.memory_space<vmem>>, vector<8x128xf32>
    tpu.vector_store %arg11[%c0_28, %c0_29], %47 {strides = array<i32>} : memref<8x128xf32, #tpu.memory_space<vmem>>, vector<8x128xf32>,
    %49 = arith.subf %47, %12 : vector<8x128xf32>
    %50 = arith.mulf %49, %49 : vector<8x128xf32>
    %cst_30 = arith.constant dense<0.000000e+00> : vector<8xf32>
    %51 = vector.multi_reduction <add>, %50, %cst_30 [1] : vector<8x128xf32> to vector<8xf32>
    %52 = vector.shape_cast %51 : vector<8xf32> to vector<8x1xf32>
    %53 = arith.mulf %52, %11 : vector<8x1xf32>
    %c0_i32 = arith.constant 0 : i32
    %54 = vector.broadcast %c0_i32 : i32 to vector<8x1xi32>
    %55 = arith.cmpi sgt, %1, %54 : vector<8x1xi32>
    %56 = arith.extui %55 : vector<8x1xi1> to vector<8x1xi32>
    %57 = arith.sitofp %56 : vector<8x1xi32> to vector<8x1xf32>
    %58 = tpu.concatenate %34, %53 in 1 : vector<8x1xf32>, vector<8x1xf32> -> vector<8x2xf32>
    %59 = vector.broadcast %57 : vector<8x1xf32> to vector<8x2xf32>
    %60 = arith.mulf %58, %59 : vector<8x2xf32>
    %c0_31 = arith.constant 0 : index
    %c0_32 = arith.constant 0 : index
    %61 = vector.load %arg13[%c0_31, %c0_32] : memref<8x2xf32, #tpu.memory_space<vmem>>, vector<8x2xf32>
    tpu.vector_store %arg13[%c0_31, %c0_32], %60 {strides = array<i32>} : memref<8x2xf32, #tpu.memory_space<vmem>>, vector<8x2xf32>,
    return
  }
  func.func @transform_0(%arg0: i32) -> (i32, i32) {
    %c0_i32 = arith.constant 0 : i32
    %c0_i32_0 = arith.constant 0 : i32
    return %arg0, %c0_i32 : i32, i32
  }
  func.func @transform_1(%arg0: i32) -> (i32, i32) {
    %c0_i32 = arith.constant 0 : i32
    %c0_i32_0 = arith.constant 0 : i32
    return %arg0, %c0_i32 : i32, i32
  }
  func.func @transform_2(%arg0: i32) -> (i32, i32) {
    %c0_i32 = arith.constant 0 : i32
    %c0_i32_0 = arith.constant 0 : i32
    %c0_i32_1 = arith.constant 0 : i32
    return %c0_i32, %c0_i32_0 : i32, i32
  }
  func.func @transform_3(%arg0: i32) -> (i32, i32) {
    %c0_i32 = arith.constant 0 : i32
    %c0_i32_0 = arith.constant 0 : i32
    return %arg0, %c0_i32 : i32, i32
  }
  func.func @transform_4(%arg0: i32) -> (i32, i32) {
    %c0_i32 = arith.constant 0 : i32
    %c0_i32_0 = arith.constant 0 : i32
    %c0_i32_1 = arith.constant 0 : i32
    return %c0_i32, %c0_i32_0 : i32, i32
  }
  func.func @transform_5(%arg0: i32) -> (i32, i32) {
    %c0_i32 = arith.constant 0 : i32
    %c0_i32_0 = arith.constant 0 : i32
    %c0_i32_1 = arith.constant 0 : i32
    return %c0_i32, %c0_i32_0 : i32, i32
  }
  func.func @transform_6(%arg0: i32) -> (i32, i32) {
    %c0_i32 = arith.constant 0 : i32
    %c0_i32_0 = arith.constant 0 : i32
    %c0_i32_1 = arith.constant 0 : i32
    return %c0_i32, %c0_i32_0 : i32, i32
  }
  func.func @transform_7(%arg0: i32) -> (i32, i32) {
    %c0_i32 = arith.constant 0 : i32
    %c0_i32_0 = arith.constant 0 : i32
    %c0_i32_1 = arith.constant 0 : i32
    return %c0_i32, %c0_i32_0 : i32, i32
  }
  func.func @transform_8(%arg0: i32) -> (i32, i32) {
    %c0_i32 = arith.constant 0 : i32
    %c0_i32_0 = arith.constant 0 : i32
    %c0_i32_1 = arith.constant 0 : i32
    return %c0_i32, %c0_i32_0 : i32, i32
  }
  func.func @transform_9(%arg0: i32) -> (i32, i32) {
    %c0_i32 = arith.constant 0 : i32
    %c0_i32_0 = arith.constant 0 : i32
    %c0_i32_1 = arith.constant 0 : i32
    return %c0_i32, %c0_i32_0 : i32, i32
  }
  func.func @transform_10(%arg0: i32) -> (i32, i32) {
    %c0_i32 = arith.constant 0 : i32
    %c0_i32_0 = arith.constant 0 : i32
    return %arg0, %c0_i32 : i32, i32
  }
  func.func @transform_11(%arg0: i32) -> (i32, i32) {
    %c0_i32 = arith.constant 0 : i32
    %c0_i32_0 = arith.constant 0 : i32
    return %arg0, %c0_i32 : i32, i32
  }
  func.func @transform_12(%arg0: i32) -> (i32, i32) {
    %c0_i32 = arith.constant 0 : i32
    %c0_i32_0 = arith.constant 0 : i32
    return %arg0, %c0_i32 : i32, i32
  }
}

</mosaic_0001>

<bundles_post_ra>
// kernel: tpu_custom_call.1
= control target key start
LH: loop header
LB: loop body
LE: loop exit
PB: predicated region body
PF: predicated region fallthrough
CT: control target
= control target key end

     0   :  { %s1536_s0 = inlined_call_operand.vmem [shape: f32[16,128], index: 0, kind: input, shape index: {}]   ;;  %s1537_s1 = inlined_call_operand.vmem [shape: s32[16,1], index: 1, kind: input, shape index: {}]   ;;  %s1538_s2 = inlined_call_operand.vmem [shape: s32[1,128], index: 2, kind: input, shape index: {}]   ;;  %s1539_s3 = inlined_call_operand.vmem [shape: f32[16,8], index: 3, kind: input, shape index: {}]   ;;  %s1540_s4 = inlined_call_operand.vmem [shape: f32[128,8], index: 4, kind: input, shape index: {}]   ;;  %s1541_s5 = inlined_call_operand.vmem [shape: f32[1,8], index: 5, kind: input, shape index: {}]   ;;  %s1542_s6 = inlined_call_operand.vmem [shape: f32[128,8], index: 6, kind: input, shape index: {}]   ;;  %s1543_s7 = inlined_call_operand.vmem [shape: f32[1,8], index: 7, kind: input, shape index: {}]   ;;  %s1544_s8 = inlined_call_operand.vmem [shape: f32[8,128], index: 8, kind: input, shape index: {}]   ;;  %s1545_s9 = inlined_call_operand.vmem [shape: f32[1,128], index: 9, kind: input, shape index: {}]   ;;  %s1546_s10 = inlined_call_operand.hbm [shape: f32[16,128], index: 10, kind: output, shape index: {0}]   ;;  %s1547_s11 = inlined_call_operand.vmem [shape: f32[16,8], index: 11, kind: output, shape index: {1}]   ;;  %s1548_s12 = inlined_call_operand.vmem [shape: f32[16,2], index: 12, kind: output, shape index: {2}]  }
   0x1   :  { %1549 = sst [smem:[#allocation6_spill]] %s1536_s0 }
   0x2   :  { %1550 = sst [smem:[#allocation7_spill]] %s1537_s1 }
   0x3   :  { %1551 = sst [smem:[#allocation8_spill]] %s1538_s2 }
   0x4   :  { %18 = vsyncpa [#allocation3], 0 }
   0x5   :  { %20 = vsyncpa [#allocation3 + $0x1], 0  ;;  %s1269_s21 = smov 0   ;;  %s1271_s22 = smov 0  }
   0x6   :  { %s1273_s23 = smov 0   ;;  %s1275_s24 = smov 0  }
   0x7 LB: > { %s1290_s25 = sadd.s32 4294967295, %s1197_s24   ;;  %s955_s26 = sadd.s32 4294967294, %s1197_s24   ;;  %s1197_s24 = sphi %s1275_s24, %s1562_s24   ;;  %s1193_s23 = sphi %s1273_s23, %s1561_s23   ;;  %s1189_s22 = sphi %s1271_s22, %s1560_s22   ;;  %s1185_s21 = sphi %s1269_s21, %s1559_s21  }
   0x8   : > { %s1294_s27 = sadd.s32 1, %s1197_s24   ;;  %s258_s28 = sadd.s32 1, %s1193_s23 }
   0x9   : > { %s255_s29 = ssub.s32 %s1197_s24, %s1294_s27  ;;  %p268_p0 = scmp.ne.s32.totalorder %s1193_s23, %s1189_s22 }
   0xa   : > { %p256_p1 = scmp.eq.s32.totalorder %s255_s29, 0  ;;  %p269_p2 = scmp.eq.s32.totalorder %s1290_s25, 1 }
   0xb   : > { %p274_p3 = scmp.ne.s32.totalorder %s1189_s22, %s1185_s21  ;;  %p275_p4 = scmp.eq.s32.totalorder %s955_s26, 1 }
   0xc   : > { %s1305_s30 = scalar_select %p256_p1, %s1193_s23, %s258_s28  }
   0xd   : > { %p1307_p5 = por %p269_p2, %p268_p0  ;;  %p1311_p6 = por %p275_p4, %p274_p3 }
   0xe   : > { %1552 = sst [smem:[#allocation5_spill]] %s1305_s30  ;;  %p958_p7 = scmp.ge.s32.totalorder %s1197_s24, 1 }
   0xf   : > { %p387_p8 = scmp.lt.s32.totalorder %s1197_s24, 3 }
  0x11   : > { %p388_p9 = pnand %p958_p7, %p387_p8 }
  0x12   : > { %p444_p10 = scmp.lt.s32.totalorder (!%p388_p9), %s1290_s25, 1  ;;  %s1555_s1 = sld [smem:[#allocation7_spill]] (!%p388_p9) }
  0x13   : > { %391 = sbr.rel (%p388_p9) target bundleno = 852 (0x354), region = 60  ;;  %s1556_s2 = sld [smem:[#allocation8_spill]] (!%p388_p9) }
  0x14   : > { %s1557_s0 = sld [smem:[#allocation6_spill]] (!%p388_p9)  ;;  %s429_s20 = sand.u32 (!%p388_p9), 1, %s1189_s22  }
  0x15   : > { %s797_s28 = scalar_lea.sflag (!%p388_p9), [#allocation3], %s429_s20 }
  0x18   : > { %v502_v0 = vld [vmem:[%s1540_s4 + $0x78] sm:$0xff]  ;;  %v1199_v2 = vmov 0   ;;  %v1200_v3 = vmov 0.0   ;;  %v501_v4 = vld [vmem:[%s1540_s4 + $0x70] sm:$0xff]  ;;  %s445_s26 = scalar_select %p444_p10, %s1290_s25, 1  ;;  %v500_v6 = vld [vmem:[%s1540_s4 + $0x68] sm:$0xff] }
  0x19   : > { %v595_v1 = vld [vmem:[%s1542_s6 + $0x78] sm:$0xff]  ;;  %1130 = vset.pattern.permute.xlu0 %v1199_v2  ;;  %1012 = vmatprep.subr.mxu0 %v1200_v3  ;;  %v594_v5 = vld [vmem:[%s1542_s6 + $0x70] sm:$0xff]  ;;  %v593_v7 = vld [vmem:[%s1542_s6 + $0x68] sm:$0xff]  ;;  %vm1201_vm1 = vmmov 0   ;;  %vm679_vm3 = vcmask 64512  }
  0x1a   : > { %1047 = vmatprep.subr.mxu1 %v1200_v3  ;;  %1013 = vmatpush3.msra.mxu0 %v502_v0  ;;  %s1337_s17 = sshll.u32 %s445_s26, 3  ;;  %v499_v9 = vld [vmem:[%s1540_s4 + $0x60] sm:$0xff]  ;;  %v498_v12 = vld [vmem:[%s1540_s4 + $0x58] sm:$0xff]  ;;  %v497_v15 = vld [vmem:[%s1540_s4 + $0x50] sm:$0xff] }
  0x1b   : > { %1048 = vmatpush3.msra.mxu1 %v595_v1  ;;  %1014 = vmatprep.subr.mxu0 %v1200_v3  ;;  %s451_s29 = scalar_lea.vmem %s1555_s1, %s1337_s17  ;;  %v592_v10 = vld [vmem:[%s1542_s6 + $0x60] sm:$0xff]  ;;  %v591_v13 = vld [vmem:[%s1542_s6 + $0x58] sm:$0xff]  ;;  %v590_v16 = vld [vmem:[%s1542_s6 + $0x50] sm:$0xff]  ;;  %s447_s15 = scalar_lea.vmem %s1557_s0, %s1337_s17 }
  0x1c   : > { %1049 = vmatprep.subr.mxu1 %v1200_v3  ;;  %1015 = vmatpush3.msra.mxu0 %v501_v4  ;;  %v1348_v8 = vld [vmem:[%s451_s29] sm:$0xff]  ;;  %v496_v17 = vld [vmem:[%s1540_s4 + $0x48] sm:$0xff]  ;;  %v494_v21 = vld [vmem:[%s1540_s4 + $0x38] sm:$0xff]  ;;  %s459_s19 = scalar_lea.vmem %s1547_s11, %s1337_s17  ;;  %s959_s29 = sshll.u32 %s429_s20, 3 }
  0x1d   : > { %1050 = vmatpush3.msra.mxu1 %v594_v5  ;;  %1016 = vmatprep.subr.mxu0 %v1200_v3  ;;  %v477_v11 = vcvt.s32.f32 %v1348_v8  ;;  %v589_v18 = vld [vmem:[%s1542_s6 + $0x48] sm:$0xff]  ;;  %v495_v19 = vld [vmem:[%s1540_s4 + $0x40] sm:$0xff]  ;;  %v587_v22 = vld [vmem:[%s1542_s6 + $0x38] sm:$0xff]  ;;  %vm779_vm0 = vcmp.gt.s32.totalorder %v1348_v8, 0  ;;  %s431_s26 = scalar_lea.vmem [#allocation2], %s959_s29  ;;  %s1202_s1 = smov [#allocation2]  }
  0x1e   : > { %1051 = vmatprep.subr.mxu1 %v1200_v3  ;;  %1017 = vmatpush3.msra.mxu0 %v500_v6  ;;  %v588_v20 = vld [vmem:[%s1542_s6 + $0x40] sm:$0xff]  ;;  %v493_v23 = vld [vmem:[%s1540_s4 + $0x30] sm:$0xff]  ;;  %v492_v25 = vld [vmem:[%s1540_s4 + $0x28] sm:$0xff]  ;;  %v971_v32 = vsel %vm779_vm0, 1.0, %v1200_v3  ;;  %s818_s16 = sshll.u32 %s431_s26, 4  ;;  %s819_s16 = int_to_ptr.vmem [resolvable:$true] %s818_s16 }
  0x1f   : > { %472 = vperm.xlu0 %1130, %v1348_v8   ;;  %1052 = vmatpush3.msra.mxu1 %v593_v7  ;;  %v478_v14 = vmax.f32 %v477_v11, 1.0  ;;  %v586_v24 = vld [vmem:[%s1542_s6 + $0x30] sm:$0xff]  ;;  %v585_v26 = vld [vmem:[%s1542_s6 + $0x28] sm:$0xff]  ;;  %v491_v27 = vld [vmem:[%s1540_s4 + $0x20] sm:$0xff]  ;;  %s1137_s30 = scalar_lea.vmem %s819_s16, 128 }
  0x20   : > { %1018 = vmatprep.subr.mxu0 %v1200_v3  ;;  %1053 = vmatprep.subr.mxu1 %v1200_v3  ;;  %v584_v28 = vld [vmem:[%s1542_s6 + $0x20] sm:$0xff]  ;;  %v490_v30 = vld [vmem:[%s1540_s4 + $0x18] sm:$0xff]  ;;  %v489_v33 = vld [vmem:[%s1540_s4 + $0x10] sm:$0xff]  ;;  %p1138_p11 = scmp.ne.s32.totalorder %s819_s16, %s1137_s30 }
  0x21   : > { %1019 = vmatpush3.msra.mxu0 %v499_v9  ;;  %1054 = vmatpush3.msra.mxu1 %v592_v10  ;;  %1131 = vrcp.f32 %v478_v14  ;;  %v583_v31 = vld [vmem:[%s1542_s6 + $0x18] sm:$0xff]  ;;  %v582_v34 = vld [vmem:[%s1542_s6 + $0x10] sm:$0xff]  ;;  %v488_v35 = vld [vmem:[%s1540_s4 + $0x8] sm:$0xff] }
  0x22   : > { %1020 = vmatprep.subr.mxu0 %v1200_v3  ;;  %1055 = vmatprep.subr.mxu1 %v1200_v3  ;;  %v581_v36 = vld [vmem:[%s1542_s6 + $0x8] sm:$0xff]  ;;  %v487_v37 = vld [vmem:[%s1540_s4] sm:$0xff]  ;;  %p1139_p12 = pnand %p1138_p11, %p1307_p5 }
  0x23   : > { %1021 = vmatpush3.msra.mxu0 %v498_v12  ;;  %1056 = vmatpush3.msra.mxu1 %v591_v13  ;;  %v580_v38 = vld [vmem:[%s1542_s6] sm:$0xff] }
  0x24   : > { %1022 = vmatprep.subr.mxu0 %v1200_v3  ;;  %1057 = vmatprep.subr.mxu1 %v1200_v3  ;;  %v965_v39 = vld [vmem:[%s1556_s2] ss:$0 sm:$0xff]  ;;  %p1140_p13 = pneg %p1139_p12  ;;  %s1141_s2 = sshll.u32 %s1202_s1, 4  ;;  %s1142_s2 = int_to_ptr.vmem [resolvable:$false] %s1141_s2 }
  0x25   : > { %1023 = vmatpush3.msra.mxu0 %v497_v15  ;;  %1058 = vmatpush3.msra.mxu1 %v590_v16  ;;  %v464_v42 = vld [vmem:[%s447_s15] sm:$0xff]  ;;  %s455_s15 = scalar_lea.vmem %s1539_s3, %s1337_s17  ;;  %s1143_s29 = scalar_lea.vmem %s1142_s2, 256 }
  0x26   : > { %1024 = vmatprep.subr.mxu0 %v1200_v3  ;;  %1059 = vmatprep.subr.mxu1 %v1200_v3  ;;  %v691_v46 = vld [vmem:[%s1544_s8] sm:$0xff]  ;;  %p1144_p0 = scmp.lt.s32.totalorder %s819_s16, %s1142_s2  ;;  %p1145_p1 = scmp.lt.s32.totalorder %s1143_s29, %s1137_s30 }
  0x27   : > { %1025 = vmatpush3.msra.mxu0 %v496_v17  ;;  %1060 = vmatpush3.msra.mxu1 %v589_v18  ;;  %v967_v47 = vld [vmem:[%s1541_s5] ss:$0 sm:$0xff] }
  0x28   : > { %1026 = vmatprep.subr.mxu0 %v1200_v3  ;;  %1061 = vmatprep.subr.mxu1 %v1200_v3  ;;  %v968_v48 = vld [vmem:[%s1543_s7] ss:$0 sm:$0xff]  ;;  %p1146_p2 = por %p1145_p1, %p1144_p0 }
  0x29   : > { %1027 = vmatpush3.msra.mxu0 %v495_v19  ;;  %1062 = vmatpush3.msra.mxu1 %v588_v20  ;;  %v684_v62 = vld [vmem:[%s455_s15] sm:$0xff]  ;;  %s973_s15 = sshll.u32 %s1290_s25, 7 }
  0x2a   : > { %1028 = vmatprep.subr.mxu0 %v1200_v3  ;;  %1063 = vmatprep.subr.mxu1 %v1200_v3  ;;  %v969_v4 = vld [vmem:[%s1545_s9] ss:$0 sm:$0xff]  ;;  %s816_s0 = scalar_lea.hbm %s1546_s10, %s973_s15  ;;  %p1147_p3 = pnand %p1146_p2, %p1140_p13 }
  0x2b   : > { %1029 = vmatpush3.msra.mxu0 %v494_v21  ;;  %1064 = vmatpush3.msra.mxu1 %v587_v22 }
  0x2c   : > { %1030 = vmatprep.subr.mxu0 %v1200_v3  ;;  %1065 = vmatprep.subr.mxu1 %v1200_v3 }
  0x2d   : > { %1031 = vmatpush3.msra.mxu0 %v493_v23  ;;  %1066 = vmatpush3.msra.mxu1 %v586_v24 }
  0x2e   : > { %1032 = vmatprep.subr.mxu0 %v1200_v3  ;;  %1067 = vmatprep.subr.mxu1 %v1200_v3  ;;  %v1424_v29 = vpop.eup %1131 }
  0x2f   : > { %1033 = vmatpush3.msra.mxu0 %v492_v25  ;;  %1068 = vmatpush3.msra.mxu1 %v585_v26 }
  0x30   : > { %1034 = vmatprep.subr.mxu0 %v1200_v3  ;;  %1069 = vmatprep.subr.mxu1 %v1200_v3 }
  0x31   : > { %483 = vperm.xlu0 %1130, %v1424_v29   ;;  %1035 = vmatpush3.msra.mxu0 %v491_v27 }
  0x32   : > { %1070 = vmatpush3.msra.mxu1 %v584_v28  ;;  %1036 = vmatprep.subr.mxu0 %v1200_v3 }
  0x33   : > { %1071 = vmatprep.subr.mxu1 %v1200_v3  ;;  %1037 = vmatpush3.msra.mxu0 %v490_v30 }
  0x34   : > { %1072 = vmatpush3.msra.mxu1 %v583_v31  ;;  %1038 = vmatprep.subr.mxu0 %v1200_v3 }
  0x35   : > { %790 = vperm.xlu0 %1130, %v971_v32   ;;  %1073 = vmatprep.subr.mxu1 %v1200_v3 }
  0x36   : > { %1039 = vmatpush3.msra.mxu0 %v489_v33  ;;  %1074 = vmatpush3.msra.mxu1 %v582_v34 }
  0x37   : > { %1040 = vmatprep.subr.mxu0 %v1200_v3  ;;  %1075 = vmatprep.subr.mxu1 %v1200_v3 }
  0x38   : > { %1041 = vmatpush3.msra.mxu0 %v488_v35  ;;  %1076 = vmatpush3.msra.mxu1 %v581_v36 }
  0x39   : > { %1042 = vmatprep.subr.mxu0 %v1200_v3  ;;  %1077 = vmatprep.subr.mxu1 %v1200_v3 }
  0x3a   : > { %1043 = vmatpush3.msra.mxu0 %v487_v37  ;;  %1044 = vmatprep.mubr.msk.f32.mxu0 %vm1201_vm1, %v1200_v3 }
  0x3b   : > { %1078 = vmatpush3.msra.mxu1 %v580_v38  ;;  %1079 = vmatprep.mubr.msk.f32.mxu1 %vm1201_vm1, %v1200_v3 }
  0x3c   : > { %1082 = vmatprep.subr.mxu0 %v1200_v3 }
  0x9a   : > { %v473_v40 = vpop.permute.xlu0 %472 }
  0x9b   : > { %vm474_vm2 = vcmp.lt.s32.totalorder %v965_v39, %v473_v40 }
  0x9c   : > { %v966_v41 = vsel %vm474_vm2, 1.0, %v1200_v3 }
  0x9d   : > { %v480_v43 = vmul.f32 %v966_v41, %v464_v42 }
  0xac   : > { %v484_v44 = vpop.permute.xlu0 %483 }
  0xad   : > { %v486_v45 = vmul.f32 %v484_v44, %v480_v43 }
  0xaf   : > { %1045 = vmatmul.mubr.f32.vlgmr.msra.gmra.mxu0 %v486_v45  ;;  %1080 = vmatmul.mubr.f32.vlgmr.msra.gmra.mxu1 %v486_v45 }
  0xb0   : > { %1084 = vmatprep.mubr.msk.f32.mxu0 %vm1201_vm1, %v1200_v3  ;;  %1083 = vmatpush3.msra.mxu0 %v691_v46 }
 0x16f   : > { %v576_v49 = vpop.f32.mrf.mxu0  ;;  %v669_v50 = vpop.f32.mrf.mxu1 }
 0x170   : > { %v577_v51 = vadd.f32 %v967_v47, %v576_v49  ;;  %v670_v52 = vadd.f32 %v968_v48, %v669_v50 }
 0x171   : > { %v1046_v53 = vpop.f32.mrf.mxu0  ;;  %v1081_v54 = vpop.f32.mrf.mxu1 }
 0x172   : > { %v674_v55 = vmul.f32 %v577_v51, %v577_v51  ;;  %v673_v56 = vadd.f32 1.0, %v670_v52  ;;  %v676_v57 = vmul.f32 1.442695, %v670_v52  ;;  %v685_v58 = vmul.f32 0.5, %v670_v52 }
 0x174   : > { %1133 = vpow2.f32 %v676_v57  ;;  %v686_v59 = vmul.f32 1.442695, %v685_v58  ;;  %v675_v60 = vsub.f32 %v673_v56, %v674_v55 }
 0x176   : > { %1135 = vpow2.f32 %v686_v59 }
 0x181   : > { %v1134_v61 = vpop.eup %1133 }
 0x182   : > { %v678_v63 = vsub.f32 %v675_v60, %v1134_v61 }
 0x183   : > { %v1136_v0 = vpop.eup %1135 }
 0x184   : > { %v688_v1 = vmul.f32 %v1136_v0, %v684_v62  ;;  %v680_v2 = vsel %vm679_vm3, %v678_v63, 0.0 }
 0x186   : > { %v689_v3 = vadd.f32 %v688_v1, %v577_v51 }
 0x188   : > { %690 = vst.msk [vmem:[%s459_s19] sm:$0xff] %vm679_vm3, %v689_v3  ;;  %1085 = vmatmul.mubr.msk.f32.vlgmr.msra.gmra.mxu0 %vm679_vm3, %v689_v3 }
 0x248   : > { %v768_v5 = vpop.f32.mrf.mxu0 }
 0x249   : > { %v769_v6 = vadd.f32 %v969_v4, %v768_v5 }
 0x24a   : > { %v1086_v7 = vpop.f32.mrf.mxu0 }
 0x24b   : > { %v772_v8 = vmul.f32 %v966_v41, %v769_v6 }
 0x24d   : > { %v774_v9 = vsub.f32 %v772_v8, %v480_v43  ;;  %773 = vst [vmem:[%s431_s26] sm:$0xff] %v772_v8 }
 0x24f   : > { %v775_v10 = vmul.f32 %v774_v9, %v774_v9 }
 0x251   : > { %776 = vadd.xlane.f32.xlu1 %v775_v10 }
 0x255   : > { %681 = vadd.xlane.f32.xlu1 %v680_v2 }
 0x256   : > { %1150 = shalt.err (!%p1147_p3)
}
 0x257   : > { %s1151_s25 = scalar_lea.hbm %s816_s0, 128  ;;  %s1155_s15 = scalar_lea.hbm %s1546_s10, 256 }
 0x258   : > { %p1152_p4 = scmp.ne.s32.totalorder %s816_s0, %s1151_s25  ;;  %p1156_p9 = scmp.lt.s32.totalorder %s816_s0, %s1546_s10 }
 0x259   : > { %p1157_p10 = scmp.lt.s32.totalorder %s1155_s15, %s1151_s25 }
 0x25a   : > { %p1153_p7 = pnand %p1152_p4, %p1307_p5 }
 0x25b   : > { %p1158_p11 = por %p1157_p10, %p1156_p9 }
 0x25c   : > { %p1154_p8 = pneg %p1153_p7 }
 0x25e   : > { %p1159_p12 = pnand %p1158_p11, %p1154_p8 }
 0x260   : > { %1162 = shalt.err (!%p1159_p12)
}
 0x261   : > { %1087 = dma.vmem_to_hbm [thread:$0]  (%p1307_p5), %s819_s16, 128, %s816_s0, %s797_s28   ;;  %vm786_vm4 = vcmask 7168   ;;  %v791_v16 = vpop.permute.xlu0 %790  ;;  %vm794_vm5 = vcmask 15360  }
 0x262   : > { %s1203_s1 = smov 1   ;;  %s463_s29 = scalar_lea.vmem %s1548_s12, %s1337_s17 }
 0x2da   : > { %v777_v11 = vpop.xlane.xlu1 %776 }
 0x2db   : > { %v778_v12 = vmul.f32 %v1424_v29, %v777_v11 }
 0x2dd   : > { %783 = vrot.lane.b32.xlu1 %v778_v12, %s1203_s1 }
 0x2de   : > { %v682_v13 = vpop.xlane.xlu1 %681 }
 0x2df   : > { %v683_v14 = vmul.f32 -0.5, %v682_v13 }
 0x34f   : > { %v784_v15 = vpop.permute.xlu1 %783 }
 0x350   : > { %v787_v17 = vsel %vm786_vm4, %v683_v14, %v784_v15 }
 0x351   : > { %v793_v18 = vmul.f32 %v791_v16, %v787_v17 }
 0x353   : > { %795 = vst.msk [vmem:[%s463_s29] sm:$0xff] %vm794_vm5, %v793_v18 }
 0x354 PF: > { %p1093_p5 = scmp.ge.s32.totalorder %s1197_s24, 2  ;;  %s836_s0 = sand.u32 1, %s1185_s21  }
 0x355   : > { %s837_s13 = scalar_lea.sflag [#allocation3], %s836_s0 }
 0x356   : > { %p1090_p13 = pnand %p1093_p5, %p1311_p6 }
 0x358   : > { %p1091_p0 = pneg %p1090_p13 }
 0x35a   : > { %1180 = dma.done.wait (%p1091_p0), %s837_s13, 128  }
 0x35b   : > { %1182 = vsyncadd (%p1091_p0), %s837_s13, 4294967168  ;;  %s1558_s17 = sld [smem:[#allocation5_spill]]  ;;  %p23_p1 = scmp.ge.s32.totalorder %s1294_s27, 4  }
 0x35c   : > { %s1559_s21 = smov %s1189_s22  ;;  %s1560_s22 = smov %s1193_s23 }
 0x35d   : > { %s1562_s24 = smov %s1294_s27  ;;  %25 = sbr.rel (!%p23_p1) target bundleno = 7 (0x7), region = 125 }
 0x361   : > { %s1561_s23 = smov %s1558_s17 }
 0x362   :  { %856 = vsyncpa [#allocation3], 1 }
 0x363   :  { %858 = vsyncpa [#allocation3 + $0x1], 1 }

// kernel: tpu_custom_call.1
= control target key start
LH: loop header
LB: loop body
LE: loop exit
PB: predicated region body
PF: predicated region fallthrough
CT: control target
= control target key end

     0   :  { %s1536_s0 = inlined_call_operand.vmem [shape: f32[16,128], index: 0, kind: input, shape index: {}]   ;;  %s1537_s1 = inlined_call_operand.vmem [shape: s32[16,1], index: 1, kind: input, shape index: {}]   ;;  %s1538_s2 = inlined_call_operand.vmem [shape: s32[1,128], index: 2, kind: input, shape index: {}]   ;;  %s1539_s3 = inlined_call_operand.vmem [shape: f32[16,8], index: 3, kind: input, shape index: {}]   ;;  %s1540_s4 = inlined_call_operand.vmem [shape: f32[128,8], index: 4, kind: input, shape index: {}]   ;;  %s1541_s5 = inlined_call_operand.vmem [shape: f32[1,8], index: 5, kind: input, shape index: {}]   ;;  %s1542_s6 = inlined_call_operand.vmem [shape: f32[128,8], index: 6, kind: input, shape index: {}]   ;;  %s1543_s7 = inlined_call_operand.vmem [shape: f32[1,8], index: 7, kind: input, shape index: {}]   ;;  %s1544_s8 = inlined_call_operand.vmem [shape: f32[8,128], index: 8, kind: input, shape index: {}]   ;;  %s1545_s9 = inlined_call_operand.vmem [shape: f32[1,128], index: 9, kind: input, shape index: {}]   ;;  %s1546_s10 = inlined_call_operand.hbm [shape: f32[16,128], index: 10, kind: output, shape index: {0}]   ;;  %s1547_s11 = inlined_call_operand.vmem [shape: f32[16,8], index: 11, kind: output, shape index: {1}]   ;;  %s1548_s12 = inlined_call_operand.vmem [shape: f32[16,2], index: 12, kind: output, shape index: {2}]  }
   0x1   :  { %1549 = sst [smem:[#allocation6_spill]] %s1536_s0 }
   0x2   :  { %1550 = sst [smem:[#allocation7_spill]] %s1537_s1 }
   0x3   :  { %1551 = sst [smem:[#allocation8_spill]] %s1538_s2 }
   0x4   :  { %18 = vsyncpa [#allocation3], 0 }
   0x5   :  { %20 = vsyncpa [#allocation3 + $0x1], 0  ;;  %s1269_s21 = smov 0   ;;  %s1271_s22 = smov 0  }
   0x6   :  { %s1273_s23 = smov 0   ;;  %s1275_s24 = smov 0  }
   0x7 LB: > { %s1290_s25 = sadd.s32 4294967295, %s1197_s24   ;;  %s955_s26 = sadd.s32 4294967294, %s1197_s24   ;;  %s1197_s24 = sphi %s1275_s24, %s1562_s24   ;;  %s1193_s23 = sphi %s1273_s23, %s1561_s23   ;;  %s1189_s22 = sphi %s1271_s22, %s1560_s22   ;;  %s1185_s21 = sphi %s1269_s21, %s1559_s21  }
   0x8   : > { %s1294_s27 = sadd.s32 1, %s1197_s24   ;;  %s258_s28 = sadd.s32 1, %s1193_s23 }
   0x9   : > { %s255_s29 = ssub.s32 %s1197_s24, %s1294_s27  ;;  %p268_p0 = scmp.ne.s32.totalorder %s1193_s23, %s1189_s22 }
   0xa   : > { %p256_p1 = scmp.eq.s32.totalorder %s255_s29, 0  ;;  %p269_p2 = scmp.eq.s32.totalorder %s1290_s25, 1 }
   0xb   : > { %p274_p3 = scmp.ne.s32.totalorder %s1189_s22, %s1185_s21  ;;  %p275_p4 = scmp.eq.s32.totalorder %s955_s26, 1 }
   0xc   : > { %s1305_s30 = scalar_select %p256_p1, %s1193_s23, %s258_s28  }
   0xd   : > { %p1307_p5 = por %p269_p2, %p268_p0  ;;  %p1311_p6 = por %p275_p4, %p274_p3 }
   0xe   : > { %1552 = sst [smem:[#allocation5_spill]] %s1305_s30  ;;  %p958_p7 = scmp.ge.s32.totalorder %s1197_s24, 1 }
   0xf   : > { %p387_p8 = scmp.lt.s32.totalorder %s1197_s24, 3 }
  0x11   : > { %p388_p9 = pnand %p958_p7, %p387_p8 }
  0x12   : > { %p444_p10 = scmp.lt.s32.totalorder (!%p388_p9), %s1290_s25, 1  ;;  %s1555_s1 = sld [smem:[#allocation7_spill]] (!%p388_p9) }
  0x13   : > { %391 = sbr.rel (%p388_p9) target bundleno = 852 (0x354), region = 60  ;;  %s1556_s2 = sld [smem:[#allocation8_spill]] (!%p388_p9) }
  0x14   : > { %s1557_s0 = sld [smem:[#allocation6_spill]] (!%p388_p9)  ;;  %s429_s20 = sand.u32 (!%p388_p9), 1, %s1189_s22  }
  0x15   : > { %s797_s28 = scalar_lea.sflag (!%p388_p9), [#allocation3], %s429_s20 }
  0x18   : > { %v502_v0 = vld [vmem:[%s1540_s4 + $0x78] sm:$0xff]  ;;  %v1199_v2 = vmov 0   ;;  %v1200_v3 = vmov 0.0   ;;  %v501_v4 = vld [vmem:[%s1540_s4 + $0x70] sm:$0xff]  ;;  %s445_s26 = scalar_select %p444_p10, %s1290_s25, 1  ;;  %v500_v6 = vld [vmem:[%s1540_s4 + $0x68] sm:$0xff] }
  0x19   : > { %v595_v1 = vld [vmem:[%s1542_s6 + $0x78] sm:$0xff]  ;;  %1130 = vset.pattern.permute.xlu0 %v1199_v2  ;;  %1012 = vmatprep.subr.mxu0 %v1200_v3  ;;  %v594_v5 = vld [vmem:[%s1542_s6 + $0x70] sm:$0xff]  ;;  %v593_v7 = vld [vmem:[%s1542_s6 + $0x68] sm:$0xff]  ;;  %vm1201_vm1 = vmmov 0   ;;  %vm679_vm3 = vcmask 64512  }
  0x1a   : > { %1047 = vmatprep.subr.mxu1 %v1200_v3  ;;  %1013 = vmatpush3.msra.mxu0 %v502_v0  ;;  %s1337_s17 = sshll.u32 %s445_s26, 3  ;;  %v499_v9 = vld [vmem:[%s1540_s4 + $0x60] sm:$0xff]  ;;  %v498_v12 = vld [vmem:[%s1540_s4 + $0x58] sm:$0xff]  ;;  %v497_v15 = vld [vmem:[%s1540_s4 + $0x50] sm:$0xff] }
  0x1b   : > { %1048 = vmatpush3.msra.mxu1 %v595_v1  ;;  %1014 = vmatprep.subr.mxu0 %v1200_v3  ;;  %s451_s29 = scalar_lea.vmem %s1555_s1, %s1337_s17  ;;  %v592_v10 = vld [vmem:[%s1542_s6 + $0x60] sm:$0xff]  ;;  %v591_v13 = vld [vmem:[%s1542_s6 + $0x58] sm:$0xff]  ;;  %v590_v16 = vld [vmem:[%s1542_s6 + $0x50] sm:$0xff]  ;;  %s447_s15 = scalar_lea.vmem %s1557_s0, %s1337_s17 }
  0x1c   : > { %1049 = vmatprep.subr.mxu1 %v1200_v3  ;;  %1015 = vmatpush3.msra.mxu0 %v501_v4  ;;  %v1348_v8 = vld [vmem:[%s451_s29] sm:$0xff]  ;;  %v496_v17 = vld [vmem:[%s1540_s4 + $0x48] sm:$0xff]  ;;  %v494_v21 = vld [vmem:[%s1540_s4 + $0x38] sm:$0xff]  ;;  %s459_s19 = scalar_lea.vmem %s1547_s11, %s1337_s17  ;;  %s959_s29 = sshll.u32 %s429_s20, 3 }
  0x1d   : > { %1050 = vmatpush3.msra.mxu1 %v594_v5  ;;  %1016 = vmatprep.subr.mxu0 %v1200_v3  ;;  %v477_v11 = vcvt.s32.f32 %v1348_v8  ;;  %v589_v18 = vld [vmem:[%s1542_s6 + $0x48] sm:$0xff]  ;;  %v495_v19 = vld [vmem:[%s1540_s4 + $0x40] sm:$0xff]  ;;  %v587_v22 = vld [vmem:[%s1542_s6 + $0x38] sm:$0xff]  ;;  %vm779_vm0 = vcmp.gt.s32.totalorder %v1348_v8, 0  ;;  %s431_s26 = scalar_lea.vmem [#allocation2], %s959_s29  ;;  %s1202_s1 = smov [#allocation2]  }
  0x1e   : > { %1051 = vmatprep.subr.mxu1 %v1200_v3  ;;  %1017 = vmatpush3.msra.mxu0 %v500_v6  ;;  %v588_v20 = vld [vmem:[%s1542_s6 + $0x40] sm:$0xff]  ;;  %v493_v23 = vld [vmem:[%s1540_s4 + $0x30] sm:$0xff]  ;;  %v492_v25 = vld [vmem:[%s1540_s4 + $0x28] sm:$0xff]  ;;  %v971_v32 = vsel %vm779_vm0, 1.0, %v1200_v3  ;;  %s818_s16 = sshll.u32 %s431_s26, 4  ;;  %s819_s16 = int_to_ptr.vmem [resolvable:$true] %s818_s16 }
  0x1f   : > { %472 = vperm.xlu0 %1130, %v1348_v8   ;;  %1052 = vmatpush3.msra.mxu1 %v593_v7  ;;  %v478_v14 = vmax.f32 %v477_v11, 1.0  ;;  %v586_v24 = vld [vmem:[%s1542_s6 + $0x30] sm:$0xff]  ;;  %v585_v26 = vld [vmem:[%s1542_s6 + $0x28] sm:$0xff]  ;;  %v491_v27 = vld [vmem:[%s1540_s4 + $0x20] sm:$0xff]  ;;  %s1137_s30 = scalar_lea.vmem %s819_s16, 128 }
  0x20   : > { %1018 = vmatprep.subr.mxu0 %v1200_v3  ;;  %1053 = vmatprep.subr.mxu1 %v1200_v3  ;;  %v584_v28 = vld [vmem:[%s1542_s6 + $0x20] sm:$0xff]  ;;  %v490_v30 = vld [vmem:[%s1540_s4 + $0x18] sm:$0xff]  ;;  %v489_v33 = vld [vmem:[%s1540_s4 + $0x10] sm:$0xff]  ;;  %p1138_p11 = scmp.ne.s32.totalorder %s819_s16, %s1137_s30 }
  0x21   : > { %1019 = vmatpush3.msra.mxu0 %v499_v9  ;;  %1054 = vmatpush3.msra.mxu1 %v592_v10  ;;  %1131 = vrcp.f32 %v478_v14  ;;  %v583_v31 = vld [vmem:[%s1542_s6 + $0x18] sm:$0xff]  ;;  %v582_v34 = vld [vmem:[%s1542_s6 + $0x10] sm:$0xff]  ;;  %v488_v35 = vld [vmem:[%s1540_s4 + $0x8] sm:$0xff] }
  0x22   : > { %1020 = vmatprep.subr.mxu0 %v1200_v3  ;;  %1055 = vmatprep.subr.mxu1 %v1200_v3  ;;  %v581_v36 = vld [vmem:[%s1542_s6 + $0x8] sm:$0xff]  ;;  %v487_v37 = vld [vmem:[%s1540_s4] sm:$0xff]  ;;  %p1139_p12 = pnand %p1138_p11, %p1307_p5 }
  0x23   : > { %1021 = vmatpush3.msra.mxu0 %v498_v12  ;;  %1056 = vmatpush3.msra.mxu1 %v591_v13  ;;  %v580_v38 = vld [vmem:[%s1542_s6] sm:$0xff] }
  0x24   : > { %1022 = vmatprep.subr.mxu0 %v1200_v3  ;;  %1057 = vmatprep.subr.mxu1 %v1200_v3  ;;  %v965_v39 = vld [vmem:[%s1556_s2] ss:$0 sm:$0xff]  ;;  %p1140_p13 = pneg %p1139_p12  ;;  %s1141_s2 = sshll.u32 %s1202_s1, 4  ;;  %s1142_s2 = int_to_ptr.vmem [resolvable:$false] %s1141_s2 }
  0x25   : > { %1023 = vmatpush3.msra.mxu0 %v497_v15  ;;  %1058 = vmatpush3.msra.mxu1 %v590_v16  ;;  %v464_v42 = vld [vmem:[%s447_s15] sm:$0xff]  ;;  %s455_s15 = scalar_lea.vmem %s1539_s3, %s1337_s17  ;;  %s1143_s29 = scalar_lea.vmem %s1142_s2, 256 }
  0x26   : > { %1024 = vmatprep.subr.mxu0 %v1200_v3  ;;  %1059 = vmatprep.subr.mxu1 %v1200_v3  ;;  %v691_v46 = vld [vmem:[%s1544_s8] sm:$0xff]  ;;  %p1144_p0 = scmp.lt.s32.totalorder %s819_s16, %s1142_s2  ;;  %p1145_p1 = scmp.lt.s32.totalorder %s1143_s29, %s1137_s30 }
  0x27   : > { %1025 = vmatpush3.msra.mxu0 %v496_v17  ;;  %1060 = vmatpush3.msra.mxu1 %v589_v18  ;;  %v967_v47 = vld [vmem:[%s1541_s5] ss:$0 sm:$0xff] }
  0x28   : > { %1026 = vmatprep.subr.mxu0 %v1200_v3  ;;  %1061 = vmatprep.subr.mxu1 %v1200_v3  ;;  %v968_v48 = vld [vmem:[%s1543_s7] ss:$0 sm:$0xff]  ;;  %p1146_p2 = por %p1145_p1, %p1144_p0 }
  0x29   : > { %1027 = vmatpush3.msra.mxu0 %v495_v19  ;;  %1062 = vmatpush3.msra.mxu1 %v588_v20  ;;  %v684_v62 = vld [vmem:[%s455_s15] sm:$0xff]  ;;  %s973_s15 = sshll.u32 %s1290_s25, 7 }
  0x2a   : > { %1028 = vmatprep.subr.mxu0 %v1200_v3  ;;  %1063 = vmatprep.subr.mxu1 %v1200_v3  ;;  %v969_v4 = vld [vmem:[%s1545_s9] ss:$0 sm:$0xff]  ;;  %s816_s0 = scalar_lea.hbm %s1546_s10, %s973_s15  ;;  %p1147_p3 = pnand %p1146_p2, %p1140_p13 }
  0x2b   : > { %1029 = vmatpush3.msra.mxu0 %v494_v21  ;;  %1064 = vmatpush3.msra.mxu1 %v587_v22 }
  0x2c   : > { %1030 = vmatprep.subr.mxu0 %v1200_v3  ;;  %1065 = vmatprep.subr.mxu1 %v1200_v3 }
  0x2d   : > { %1031 = vmatpush3.msra.mxu0 %v493_v23  ;;  %1066 = vmatpush3.msra.mxu1 %v586_v24 }
  0x2e   : > { %1032 = vmatprep.subr.mxu0 %v1200_v3  ;;  %1067 = vmatprep.subr.mxu1 %v1200_v3  ;;  %v1424_v29 = vpop.eup %1131 }
  0x2f   : > { %1033 = vmatpush3.msra.mxu0 %v492_v25  ;;  %1068 = vmatpush3.msra.mxu1 %v585_v26 }
  0x30   : > { %1034 = vmatprep.subr.mxu0 %v1200_v3  ;;  %1069 = vmatprep.subr.mxu1 %v1200_v3 }
  0x31   : > { %483 = vperm.xlu0 %1130, %v1424_v29   ;;  %1035 = vmatpush3.msra.mxu0 %v491_v27 }
  0x32   : > { %1070 = vmatpush3.msra.mxu1 %v584_v28  ;;  %1036 = vmatprep.subr.mxu0 %v1200_v3 }
  0x33   : > { %1071 = vmatprep.subr.mxu1 %v1200_v3  ;;  %1037 = vmatpush3.msra.mxu0 %v490_v30 }
  0x34   : > { %1072 = vmatpush3.msra.mxu1 %v583_v31  ;;  %1038 = vmatprep.subr.mxu0 %v1200_v3 }
  0x35   : > { %790 = vperm.xlu0 %1130, %v971_v32   ;;  %1073 = vmatprep.subr.mxu1 %v1200_v3 }
  0x36   : > { %1039 = vmatpush3.msra.mxu0 %v489_v33  ;;  %1074 = vmatpush3.msra.mxu1 %v582_v34 }
  0x37   : > { %1040 = vmatprep.subr.mxu0 %v1200_v3  ;;  %1075 = vmatprep.subr.mxu1 %v1200_v3 }
  0x38   : > { %1041 = vmatpush3.msra.mxu0 %v488_v35  ;;  %1076 = vmatpush3.msra.mxu1 %v581_v36 }
  0x39   : > { %1042 = vmatprep.subr.mxu0 %v1200_v3  ;;  %1077 = vmatprep.subr.mxu1 %v1200_v3 }
  0x3a   : > { %1043 = vmatpush3.msra.mxu0 %v487_v37  ;;  %1044 = vmatprep.mubr.msk.f32.mxu0 %vm1201_vm1, %v1200_v3 }
  0x3b   : > { %1078 = vmatpush3.msra.mxu1 %v580_v38  ;;  %1079 = vmatprep.mubr.msk.f32.mxu1 %vm1201_vm1, %v1200_v3 }
  0x3c   : > { %1082 = vmatprep.subr.mxu0 %v1200_v3 }
  0x9a   : > { %v473_v40 = vpop.permute.xlu0 %472 }
  0x9b   : > { %vm474_vm2 = vcmp.lt.s32.totalorder %v965_v39, %v473_v40 }
  0x9c   : > { %v966_v41 = vsel %vm474_vm2, 1.0, %v1200_v3 }
  0x9d   : > { %v480_v43 = vmul.f32 %v966_v41, %v464_v42 }
  0xac   : > { %v484_v44 = vpop.permute.xlu0 %483 }
  0xad   : > { %v486_v45 = vmul.f32 %v484_v44, %v480_v43 }
  0xaf   : > { %1045 = vmatmul.mubr.f32.vlgmr.msra.gmra.mxu0 %v486_v45  ;;  %1080 = vmatmul.mubr.f32.vlgmr.msra.gmra.mxu1 %v486_v45 }
  0xb0   : > { %1084 = vmatprep.mubr.msk.f32.mxu0 %vm1201_vm1, %v1200_v3  ;;  %1083 = vmatpush3.msra.mxu0 %v691_v46 }
 0x16f   : > { %v576_v49 = vpop.f32.mrf.mxu0  ;;  %v669_v50 = vpop.f32.mrf.mxu1 }
 0x170   : > { %v577_v51 = vadd.f32 %v967_v47, %v576_v49  ;;  %v670_v52 = vadd.f32 %v968_v48, %v669_v50 }
 0x171   : > { %v1046_v53 = vpop.f32.mrf.mxu0  ;;  %v1081_v54 = vpop.f32.mrf.mxu1 }
 0x172   : > { %v674_v55 = vmul.f32 %v577_v51, %v577_v51  ;;  %v673_v56 = vadd.f32 1.0, %v670_v52  ;;  %v676_v57 = vmul.f32 1.442695, %v670_v52  ;;  %v685_v58 = vmul.f32 0.5, %v670_v52 }
 0x174   : > { %1133 = vpow2.f32 %v676_v57  ;;  %v686_v59 = vmul.f32 1.442695, %v685_v58  ;;  %v675_v60 = vsub.f32 %v673_v56, %v674_v55 }
 0x176   : > { %1135 = vpow2.f32 %v686_v59 }
 0x181   : > { %v1134_v61 = vpop.eup %1133 }
 0x182   : > { %v678_v63 = vsub.f32 %v675_v60, %v1134_v61 }
 0x183   : > { %v1136_v0 = vpop.eup %1135 }
 0x184   : > { %v688_v1 = vmul.f32 %v1136_v0, %v684_v62  ;;  %v680_v2 = vsel %vm679_vm3, %v678_v63, 0.0 }
 0x186   : > { %v689_v3 = vadd.f32 %v688_v1, %v577_v51 }
 0x188   : > { %690 = vst.msk [vmem:[%s459_s19] sm:$0xff] %vm679_vm3, %v689_v3  ;;  %1085 = vmatmul.mubr.msk.f32.vlgmr.msra.gmra.mxu0 %vm679_vm3, %v689_v3 }
 0x248   : > { %v768_v5 = vpop.f32.mrf.mxu0 }
 0x249   : > { %v769_v6 = vadd.f32 %v969_v4, %v768_v5 }
 0x24a   : > { %v1086_v7 = vpop.f32.mrf.mxu0 }
 0x24b   : > { %v772_v8 = vmul.f32 %v966_v41, %v769_v6 }
 0x24d   : > { %v774_v9 = vsub.f32 %v772_v8, %v480_v43  ;;  %773 = vst [vmem:[%s431_s26] sm:$0xff] %v772_v8 }
 0x24f   : > { %v775_v10 = vmul.f32 %v774_v9, %v774_v9 }
 0x251   : > { %776 = vadd.xlane.f32.xlu1 %v775_v10 }
 0x255   : > { %681 = vadd.xlane.f32.xlu1 %v680_v2 }
 0x256   : > { %1150 = shalt.err (!%p1147_p3)
}
 0x257   : > { %s1151_s25 = scalar_lea.hbm %s816_s0, 128  ;;  %s1155_s15 = scalar_lea.hbm %s1546_s10, 256 }
 0x258   : > { %p1152_p4 = scmp.ne.s32.totalorder %s816_s0, %s1151_s25  ;;  %p1156_p9 = scmp.lt.s32.totalorder %s816_s0, %s1546_s10 }
 0x259   : > { %p1157_p10 = scmp.lt.s32.totalorder %s1155_s15, %s1151_s25 }
 0x25a   : > { %p1153_p7 = pnand %p1152_p4, %p1307_p5 }
 0x25b   : > { %p1158_p11 = por %p1157_p10, %p1156_p9 }
 0x25c   : > { %p1154_p8 = pneg %p1153_p7 }
 0x25e   : > { %p1159_p12 = pnand %p1158_p11, %p1154_p8 }
 0x260   : > { %1162 = shalt.err (!%p1159_p12)
}
 0x261   : > { %1087 = dma.vmem_to_hbm [thread:$0]  (%p1307_p5), %s819_s16, 128, %s816_s0, %s797_s28   ;;  %vm786_vm4 = vcmask 7168   ;;  %v791_v16 = vpop.permute.xlu0 %790  ;;  %vm794_vm5 = vcmask 15360  }
 0x262   : > { %s1203_s1 = smov 1   ;;  %s463_s29 = scalar_lea.vmem %s1548_s12, %s1337_s17 }
 0x2da   : > { %v777_v11 = vpop.xlane.xlu1 %776 }
 0x2db   : > { %v778_v12 = vmul.f32 %v1424_v29, %v777_v11 }
 0x2dd   : > { %783 = vrot.lane.b32.xlu1 %v778_v12, %s1203_s1 }
 0x2de   : > { %v682_v13 = vpop.xlane.xlu1 %681 }
 0x2df   : > { %v683_v14 = vmul.f32 -0.5, %v682_v13 }
 0x34f   : > { %v784_v15 = vpop.permute.xlu1 %783 }
 0x350   : > { %v787_v17 = vsel %vm786_vm4, %v683_v14, %v784_v15 }
 0x351   : > { %v793_v18 = vmul.f32 %v791_v16, %v787_v17 }
 0x353   : > { %795 = vst.msk [vmem:[%s463_s29] sm:$0xff] %vm794_vm5, %v793_v18 }
 0x354 PF: > { %p1093_p5 = scmp.ge.s32.totalorder %s1197_s24, 2  ;;  %s836_s0 = sand.u32 1, %s1185_s21  }
 0x355   : > { %s837_s13 = scalar_lea.sflag [#allocation3], %s836_s0 }
 0x356   : > { %p1090_p13 = pnand %p1093_p5, %p1311_p6 }
 0x358   : > { %p1091_p0 = pneg %p1090_p13 }
 0x35a   : > { %1180 = dma.done.wait (%p1091_p0), %s837_s13, 128  }
 0x35b   : > { %1182 = vsyncadd (%p1091_p0), %s837_s13, 4294967168  ;;  %s1558_s17 = sld [smem:[#allocation5_spill]]  ;;  %p23_p1 = scmp.ge.s32.totalorder %s1294_s27, 4  }
 0x35c   : > { %s1559_s21 = smov %s1189_s22  ;;  %s1560_s22 = smov %s1193_s23 }
 0x35d   : > { %s1562_s24 = smov %s1294_s27  ;;  %25 = sbr.rel (!%p23_p1) target bundleno = 7 (0x7), region = 125 }
 0x361   : > { %s1561_s23 = smov %s1558_s17 }
 0x362   :  { %856 = vsyncpa [#allocation3], 1 }
 0x363   :  { %858 = vsyncpa [#allocation3 + $0x1], 1 }

</bundles_post_ra>
